<compile_context>
chip_gen: v6e
topology: v6e:2x2x1
jax: 0.10.0
libtpu: 0.0.40
codegen_flags: <defaults>
</compile_context>

<pallas_src>
import jax
import jax.numpy as jnp
from jax.experimental import pallas as pl
from jax.experimental.pallas import tpu as pltpu

EPS = 1e-5  # nn.LayerNorm default


def prenorm_kernel(x_ref, g_ref, b_ref, w_ref, wb_ref, o_ref):
    # x_ref: (TM, D) tile of rows
    # g_ref, b_ref: (1, D) f32 LayerNorm affine params
    # w_ref: (D, D) bf16 linear weight, wb_ref: (1, D) f32 linear bias
    x = x_ref[...].astype(jnp.float32)
    inv_d = 1.0 / x.shape[-1]

    # --- LayerNorm over last dim: single sweep for E[x] and E[x^2] ---
    mean = jnp.sum(x, axis=-1, keepdims=True) * inv_d
    ex2 = jnp.sum(x * x, axis=-1, keepdims=True) * inv_d
    var = jnp.maximum(ex2 - mean * mean, 0.0)      # guard f32 cancellation
    inv = jax.lax.rsqrt(var + EPS)                 # EUP slot
    inv_g = inv * g_ref[...]                       # fold gamma once per tile
    y = (x - mean) * inv_g + b_ref[...]

    # --- fn: Linear(D, D) on normalized activations ---
    # bf16 operands -> native MXU rate; f32 accumulation preserves accuracy.
    out = jnp.dot(y.astype(jnp.bfloat16), w_ref[...],
                  preferred_element_type=jnp.float32) + wb_ref[...]
    o_ref[...] = out.astype(o_ref.dtype)


def prenorm(x, gamma, beta, w, wb, *, tile_m=512):
    """x: (B, N, D). Returns fn(LayerNorm(x)) with fn = y @ w + wb."""
    B, N, D = x.shape
    assert D % 128 == 0, "D must be a multiple of 128 (lane-dense output tiles)"
    M = B * N
    x2 = x.reshape(M, D)
    gamma2 = gamma.reshape(1, D).astype(jnp.float32)
    beta2 = beta.reshape(1, D).astype(jnp.float32)
    wb2 = wb.reshape(1, D).astype(jnp.float32)
    w_bf16 = w.astype(jnp.bfloat16)   # halves weight VMEM footprint, MXU-native

    # TODO(synk): for D >= 2048 add a K/N grid axis for the weight with an f32
    # VMEM accumulator; a single (D, D) block will not fit v7x's 64 MiB VMEM.

    # Row tile: as large as possible, multiple of 8 (or the full extent).
    if M <= tile_m:
        tm = M
    else:
        tm = max(8, (tile_m // 8) * 8)
    grid = (pl.cdiv(M, tm),)

    # Explicit VMEM budget: double-buffered x/out tiles + double-buffered bf16
    # weight + small params, with headroom. Clamped to stay portable to v7x.
    itemsize = jnp.dtype(x.dtype).itemsize
    vmem_bytes = (2 * tm * D * itemsize          # x tiles
                  + 2 * tm * D * itemsize        # out tiles
                  + 2 * D * D * 2                # bf16 weight
                  + 6 * D * 4                    # gamma / beta / bias
                  + (2 << 20))                   # headroom
    vmem_limit = int(min(max(2 * vmem_bytes, 32 << 20), 100 << 20))

    out2 = pl.pallas_call(
        prenorm_kernel,
        out_shape=jax.ShapeDtypeStruct((M, D), x.dtype),
        grid_spec=pltpu.PrefetchScalarGridSpec(
            num_scalar_prefetch=0,
            grid=grid,
            in_specs=[
                pl.BlockSpec((tm, D), lambda i: (i, 0)),   # x rows tile
                pl.BlockSpec((1, D), lambda i: (0, 0)),    # gamma
                pl.BlockSpec((1, D), lambda i: (0, 0)),    # beta
                pl.BlockSpec((D, D), lambda i: (0, 0)),    # weight (constant idx,
                                                           #  not re-fetched)
                pl.BlockSpec((1, D), lambda i: (0, 0)),    # linear bias
            ],
            out_specs=pl.BlockSpec((tm, D), lambda i: (i, 0)),
        ),
        compiler_params=pltpu.CompilerParams(
            dimension_semantics=("parallel",),   # row axis shards across TCs (v7x)
            vmem_limit_bytes=vmem_limit,
        ),
    )(x2, gamma2, beta2, w_bf16, wb2)

    return out2.reshape(B, N, D)


def prenorm_ref(x, gamma, beta, w, wb):
    xf = x.astype(jnp.float32)
    mean = jnp.mean(xf, axis=-1, keepdims=True)
    var = jnp.mean((xf - mean) ** 2, axis=-1, keepdims=True)
    y = (xf - mean) * jax.lax.rsqrt(var + EPS) * gamma + beta
    return (y @ w + wb).astype(x.dtype)


if __name__ == "__main__":
    # Small shapes consistent with the module; D lane-dense (multiple of 128).
    B, N, D = 2, 8, 128

    key = jax.random.PRNGKey(0)
    kx, kw, _ = jax.random.split(key, 3)

    x = jax.random.normal(kx, (B, N, D), dtype=jnp.float32)

    # LayerNorm params: PyTorch defaults (ones/zeros); Linear: small weights, zero bias.
    gamma = jnp.ones((D,), dtype=jnp.float32)
    beta = jnp.zeros((D,), dtype=jnp.float32)
    w = jax.random.normal(kw, (D, D), dtype=jnp.float32) * 0.02
    wb = jnp.zeros((D,), dtype=jnp.float32)

    out = prenorm(x, gamma, beta, w, wb)
    out = jax.block_until_ready(out)

    ref = prenorm_ref(x, gamma, beta, w, wb)
    assert out.shape == (B, N, D)
    # Tolerance accounts for bf16 MXU operands (f32 accumulation).
    assert jnp.allclose(out, ref, atol=2e-2, rtol=2e-2), "mismatch vs reference"

    print("KERNEL_OK")
</pallas_src>

<mosaic_0001>
module attributes {stable_mosaic.version = 11 : i64} {
  func.func @prenorm_kernel(%arg0: i32, %arg1: memref<16x128xf32, #tpu.memory_space<vmem>>, %arg2: memref<1x128xf32, #tpu.memory_space<vmem>>, %arg3: memref<1x128xf32, #tpu.memory_space<vmem>>, %arg4: memref<128x128xbf16, #tpu.memory_space<vmem>>, %arg5: memref<1x128xf32, #tpu.memory_space<vmem>>, %arg6: memref<16x128xf32, #tpu.memory_space<vmem>>) attributes {dimension_semantics = [#tpu.dimension_semantics<parallel>], iteration_bounds = array<i64: 1>, scalar_prefetch = 0 : i64, scratch_operands = 0 : i64, tpu.core_type = #tpu.core_type<tc>, window_params = [{transform_indices = @transform_0, window_bounds = array<i64: 16, 128>}, {pipeline_mode = #tpu.pipeline_mode<synchronous>, transform_indices = @transform_1, window_bounds = array<i64: 1, 128>}, {pipeline_mode = #tpu.pipeline_mode<synchronous>, transform_indices = @transform_2, window_bounds = array<i64: 1, 128>}, {pipeline_mode = #tpu.pipeline_mode<synchronous>, transform_indices = @transform_3, window_bounds = array<i64: 128, 128>}, {pipeline_mode = #tpu.pipeline_mode<synchronous>, transform_indices = @transform_4, window_bounds = array<i64: 1, 128>}, {transform_indices = @transform_5, window_bounds = array<i64: 16, 128>}]} {
    %c0 = arith.constant 0 : index
    %c0_0 = arith.constant 0 : index
    %0 = vector.load %arg1[%c0, %c0_0] : memref<16x128xf32, #tpu.memory_space<vmem>>, vector<16x128xf32>
    %cst = arith.constant dense<0.000000e+00> : vector<16xf32>
    %1 = vector.multi_reduction <add>, %0, %cst [1] : vector<16x128xf32> to vector<16xf32>
    %2 = vector.shape_cast %1 : vector<16xf32> to vector<16x1xf32>
    %cst_1 = arith.constant 7.812500e-03 : f32
    %3 = vector.broadcast %cst_1 : f32 to vector<16x1xf32>
    %4 = arith.mulf %2, %3 : vector<16x1xf32>
    %5 = arith.mulf %0, %0 : vector<16x128xf32>
    %cst_2 = arith.constant dense<0.000000e+00> : vector<16xf32>
    %6 = vector.multi_reduction <add>, %5, %cst_2 [1] : vector<16x128xf32> to vector<16xf32>
    %7 = vector.shape_cast %6 : vector<16xf32> to vector<16x1xf32>
    %cst_3 = arith.constant 7.812500e-03 : f32
    %8 = vector.broadcast %cst_3 : f32 to vector<16x1xf32>
    %9 = arith.mulf %7, %8 : vector<16x1xf32>
    %10 = arith.mulf %4, %4 : vector<16x1xf32>
    %11 = arith.subf %9, %10 : vector<16x1xf32>
    %cst_4 = arith.constant 0.000000e+00 : f32
    %12 = vector.broadcast %cst_4 : f32 to vector<16x1xf32>
    %13 = arith.maximumf %11, %12 : vector<16x1xf32>
    %cst_5 = arith.constant 9.99999974E-6 : f32
    %14 = vector.broadcast %cst_5 : f32 to vector<16x1xf32>
    %15 = arith.addf %13, %14 : vector<16x1xf32>
    %16 = math.rsqrt %15 : vector<16x1xf32>
    %c0_6 = arith.constant 0 : index
    %c0_7 = arith.constant 0 : index
    %17 = vector.load %arg2[%c0_6, %c0_7] : memref<1x128xf32, #tpu.memory_space<vmem>>, vector<1x128xf32>
    %18 = vector.broadcast %16 : vector<16x1xf32> to vector<16x128xf32>
    %19 = vector.broadcast %17 : vector<1x128xf32> to vector<16x128xf32>
    %20 = arith.mulf %18, %19 : vector<16x128xf32>
    %21 = vector.broadcast %4 : vector<16x1xf32> to vector<16x128xf32>
    %22 = arith.subf %0, %21 : vector<16x128xf32>
    %23 = arith.mulf %22, %20 : vector<16x128xf32>
    %c0_8 = arith.constant 0 : index
    %c0_9 = arith.constant 0 : index
    %24 = vector.load %arg3[%c0_8, %c0_9] : memref<1x128xf32, #tpu.memory_space<vmem>>, vector<1x128xf32>
    %25 = vector.broadcast %24 : vector<1x128xf32> to vector<16x128xf32>
    %26 = arith.addf %23, %25 : vector<16x128xf32>
    %27 = arith.truncf %26 : vector<16x128xf32> to vector<16x128xbf16>
    %c0_10 = arith.constant 0 : index
    %c0_11 = arith.constant 0 : index
    %28 = vector.load %arg4[%c0_10, %c0_11] : memref<128x128xbf16, #tpu.memory_space<vmem>>, vector<128x128xbf16>
    %cst_12 = arith.constant dense<0.000000e+00> : vector<16x128xf32>
    %29 = tpu.matmul %27, %28, %cst_12 {dimension_numbers = #tpu.dot_dimension_numbers<[1], [0], [0], [1], [0, 0, 1, 1], [], []>} : vector<16x128xbf16>, vector<128x128xbf16>, vector<16x128xf32> -> vector<16x128xf32>
    %c0_13 = arith.constant 0 : index
    %c0_14 = arith.constant 0 : index
    %30 = vector.load %arg5[%c0_13, %c0_14] : memref<1x128xf32, #tpu.memory_space<vmem>>, vector<1x128xf32>
    %31 = vector.broadcast %30 : vector<1x128xf32> to vector<16x128xf32>
    %32 = arith.addf %29, %31 : vector<16x128xf32>
    %c0_15 = arith.constant 0 : index
    %c0_16 = arith.constant 0 : index
    %33 = vector.load %arg6[%c0_15, %c0_16] : memref<16x128xf32, #tpu.memory_space<vmem>>, vector<16x128xf32>
    tpu.vector_store %arg6[%c0_15, %c0_16], %32 {strides = array<i32>} : memref<16x128xf32, #tpu.memory_space<vmem>>, vector<16x128xf32>,
    return
  }
  func.func @transform_0(%arg0: i32) -> (i32, i32) {
    %c0_i32 = arith.constant 0 : i32
    %c0_i32_0 = arith.constant 0 : i32
    return %arg0, %c0_i32 : i32, i32
  }
  func.func @transform_1(%arg0: i32) -> (i32, i32) {
    %c0_i32 = arith.constant 0 : i32
    %c0_i32_0 = arith.constant 0 : i32
    %c0_i32_1 = arith.constant 0 : i32
    return %c0_i32, %c0_i32_0 : i32, i32
  }
  func.func @transform_2(%arg0: i32) -> (i32, i32) {
    %c0_i32 = arith.constant 0 : i32
    %c0_i32_0 = arith.constant 0 : i32
    %c0_i32_1 = arith.constant 0 : i32
    return %c0_i32, %c0_i32_0 : i32, i32
  }
  func.func @transform_3(%arg0: i32) -> (i32, i32) {
    %c0_i32 = arith.constant 0 : i32
    %c0_i32_0 = arith.constant 0 : i32
    %c0_i32_1 = arith.constant 0 : i32
    return %c0_i32, %c0_i32_0 : i32, i32
  }
  func.func @transform_4(%arg0: i32) -> (i32, i32) {
    %c0_i32 = arith.constant 0 : i32
    %c0_i32_0 = arith.constant 0 : i32
    %c0_i32_1 = arith.constant 0 : i32
    return %c0_i32, %c0_i32_0 : i32, i32
  }
  func.func @transform_5(%arg0: i32) -> (i32, i32) {
    %c0_i32 = arith.constant 0 : i32
    %c0_i32_0 = arith.constant 0 : i32
    return %arg0, %c0_i32 : i32, i32
  }
}

</mosaic_0001>

<bundles_post_ra>
// kernel: tpu_custom_call.1
= control target key start
LH: loop header
LB: loop body
LE: loop exit
PB: predicated region body
PF: predicated region fallthrough
CT: control target
= control target key end

     0   :  { %10 = vsyncpa [#allocation3], 0  ;;  %s421_s0 = inlined_call_operand.hbm [shape: f32[16,128], index: 0, kind: input, shape index: {}]   ;;  %s422_s1 = inlined_call_operand.vmem [shape: f32[1,128], index: 1, kind: input, shape index: {}]   ;;  %s423_s2 = inlined_call_operand.vmem [shape: f32[1,128], index: 2, kind: input, shape index: {}]   ;;  %s424_s3 = inlined_call_operand.hbm [shape: bf16[128,128], index: 3, kind: input, shape index: {}]   ;;  %s425_s4 = inlined_call_operand.vmem [shape: f32[1,128], index: 4, kind: input, shape index: {}]   ;;  %s426_s5 = inlined_call_operand.hbm [shape: f32[16,128], index: 5, kind: output, shape index: {}]  }
   0x1   :  { %11 = vsyncpa [#allocation6], 0 }
   0x2   :  { %12 = vsyncpa [#allocation4], 0  ;;  %s358_s18 = smov [#allocation2]  }
   0x3   :  { %s18_s19 = sshll.u32 %s358_s18, 4  ;;  %s19_s19 = int_to_ptr.vmem [resolvable:$true] %s18_s19 }
   0x4   :  { %s300_s20 = scalar_lea.vmem %s19_s19, 256  ;;  %p305_p1 = scmp.lt.s32.totalorder %s19_s19, %s19_s19 }
   0x5   :  { %p301_p0 = scmp.ne.s32.totalorder %s19_s19, %s300_s20  ;;  %p306_p2 = scmp.lt.s32.totalorder %s300_s20, %s300_s20 }
   0x7   :  { %p307_p3 = por %p306_p2, %p305_p1 }
   0x9   :  { %p308_p4 = pnand %p307_p3, %p301_p0 }
   0xb   :  { %311 = shalt.err (!%p308_p4)
}
   0xc   :  { %s359_s21 = smov 128   ;;  %s360_s22 = smov 8  }
   0xd   :  { %24 = dma.hbm_to_vmem [thread:$0]  %s421_s0, 256, %s19_s19, [#allocation3], %s359_s21, %s359_s21, %s360_s22  }
   0xe   :  { %s361_s25 = smov [#allocation5]  }
   0xf   :  { %s34_s26 = sshll.u32 %s361_s25, 4  ;;  %s35_s26 = int_to_ptr.vmem [resolvable:$true] %s34_s26 }
  0x10   :  { %s320_s27 = scalar_lea.vmem %s35_s26, 1024  ;;  %p325_p6 = scmp.lt.s32.totalorder %s35_s26, %s35_s26 }
  0x11   :  { %p321_p5 = scmp.ne.s32.totalorder %s35_s26, %s320_s27  ;;  %p326_p7 = scmp.lt.s32.totalorder %s320_s27, %s320_s27 }
  0x13   :  { %p327_p8 = por %p326_p7, %p325_p6 }
  0x15   :  { %p328_p9 = pnand %p327_p8, %p321_p5 }
  0x17   :  { %331 = shalt.err (!%p328_p9)
}
  0x18   :  { %s362_s28 = smov 64   ;;  %s363_s29 = smov 4  }
  0x19   :  { %40 = dma.hbm_to_vmem [thread:$0]  %s424_s3, 1024, %s35_s26, [#allocation6], %s362_s28, %s362_s28, %s363_s29  }
  0x1a   :  { %352 = dma.done.wait [#allocation3], 256  }
  0x1b   :  { %353 = vsyncadd [#allocation3], 4294967040 }
  0x1c   :  { %354 = dma.done.wait [#allocation6], 1024  }
  0x1d   :  { %355 = vsyncadd [#allocation6], 4294966272  ;;  %v50_v0 = vld [vmem:[#allocation2] sm:$0xff]  ;;  %v51_v1 = vld [vmem:[#allocation2 + $0x8] sm:$0xff]  ;;  %v364_v5 = vmov 0.0   ;;  %vm365_vm0 = vmmov 0  }
  0x1e   :  { %52 = vadd.xlane.f32.xlu0 %v50_v0  ;;  %v58_v2 = vmul.f32 %v50_v0, %v50_v0  ;;  %v59_v3 = vmul.f32 %v51_v1, %v51_v1  ;;  %v280_v4 = vld [vmem:[#allocation5 + $0x38] sm:$0xff]   ;;  %251 = vmatprep.subr.bf16.mxu0 %v364_v5  ;;  %v281_v6 = vld [vmem:[#allocation5 + $0x30] sm:$0xff]   ;;  %v282_v7 = vld [vmem:[#allocation5 + $0x28] sm:$0xff]  }
  0x1f   :  { %252 = vmatpush3.bf16.msra.mxu0 %v280_v4  ;;  %v283_v8 = vld [vmem:[#allocation5 + $0x20] sm:$0xff]   ;;  %267 = vmatprep.mubr.msk.bf16.mxu0 %vm365_vm0, %v364_v5  ;;  %v284_v9 = vld [vmem:[#allocation5 + $0x18] sm:$0xff]   ;;  %v285_v10 = vld [vmem:[#allocation5 + $0x10] sm:$0xff]  }
  0x20   :  { %60 = vadd.xlane.f32.xlu1 %v58_v2  ;;  %253 = vmatprep.subr.bf16.mxu0 %v364_v5  ;;  %v286_v11 = vld [vmem:[#allocation5 + $0x8] sm:$0xff]   ;;  %v287_v12 = vld [vmem:[#allocation5] sm:$0xff]   ;;  %v231_v29 = vld [vmem:[%s422_s1] ss:$0 sm:$0xff]  ;;  %s366_s1 = smov [#allocation7]  }
  0x21   :  { %v232_v37 = vld [vmem:[%s423_s2] ss:$0 sm:$0xff]  ;;  %s218_s11 = sshll.u32 %s366_s1, 4  ;;  %s219_s11 = int_to_ptr.vmem [resolvable:$true] %s218_s11 }
  0x22   :  { %54 = vadd.xlane.f32.xlu0 %v51_v1  ;;  %v233_v42 = vld [vmem:[%s425_s4] ss:$0 sm:$0xff]  ;;  %s332_s2 = scalar_lea.vmem %s219_s11, 256  ;;  %p337_p11 = scmp.lt.s32.totalorder %s219_s11, %s219_s11 }
  0x23   :  { %254 = vmatpush3.bf16.msra.mxu0 %v281_v6  ;;  %p333_p10 = scmp.ne.s32.totalorder %s219_s11, %s332_s2  ;;  %p338_p12 = scmp.lt.s32.totalorder %s332_s2, %s332_s2 }
  0x24   :  { %62 = vadd.xlane.f32.xlu1 %v59_v3  ;;  %255 = vmatprep.subr.bf16.mxu0 %v364_v5 }
  0x25   :  { %p339_p13 = por %p338_p12, %p337_p11 }
  0x27   :  { %256 = vmatpush3.bf16.msra.mxu0 %v282_v7  ;;  %p340_p0 = pnand %p339_p13, %p333_p10 }
  0x28   :  { %257 = vmatprep.subr.bf16.mxu0 %v364_v5 }
  0x2b   :  { %258 = vmatpush3.bf16.msra.mxu0 %v283_v8 }
  0x2c   :  { %259 = vmatprep.subr.bf16.mxu0 %v364_v5 }
  0x2f   :  { %260 = vmatpush3.bf16.msra.mxu0 %v284_v9 }
  0x30   :  { %261 = vmatprep.subr.bf16.mxu0 %v364_v5 }
  0x33   :  { %262 = vmatpush3.bf16.msra.mxu0 %v285_v10 }
  0x34   :  { %263 = vmatprep.subr.bf16.mxu0 %v364_v5 }
  0x37   :  { %264 = vmatpush3.bf16.msra.mxu0 %v286_v11 }
  0x38   :  { %265 = vmatprep.subr.bf16.mxu0 %v364_v5 }
  0x3b   :  { %266 = vmatpush3.bf16.msra.mxu0 %v287_v12 }
  0xa7   :  { %v53_v13 = vpop.xlane.xlu0 %52 }
  0xa8   :  { %v56_v14 = vmul.f32 0.0078125, %v53_v13 }
  0xa9   :  { %v61_v15 = vpop.xlane.xlu1 %60 }
  0xaa   :  { %v66_v16 = vmul.f32 %v56_v14, %v56_v14  ;;  %v64_v17 = vmul.f32 0.0078125, %v61_v15  ;;  %v85_v32 = vsub.f32 %v50_v0, %v56_v14 }
  0xab   :  { %v55_v18 = vpop.xlane.xlu0 %54 }
  0xac   :  { %v68_v19 = vsub.f32 %v64_v17, %v66_v16  ;;  %v57_v20 = vmul.f32 0.0078125, %v55_v18 }
  0xad   :  { %v63_v21 = vpop.xlane.xlu1 %62 }
  0xae   :  { %v70_v22 = vmax.f32 %v68_v19, 0.0  ;;  %v67_v23 = vmul.f32 %v57_v20, %v57_v20  ;;  %v65_v24 = vmul.f32 0.0078125, %v63_v21  ;;  %v86_v34 = vsub.f32 %v51_v1, %v57_v20 }
  0xb0   :  { %v72_v25 = vadd.f32 1e-05, %v70_v22  ;;  %v69_v26 = vsub.f32 %v65_v24, %v67_v23 }
  0xb2   :  { %288 = vrsqrt.f32 %v72_v25  ;;  %v71_v27 = vmax.f32 %v69_v26, 0.0 }
  0xb4   :  { %v73_v28 = vadd.f32 1e-05, %v71_v27 }
  0xb6   :  { %290 = vrsqrt.f32 %v73_v28 }
  0xbf   :  { %v289_v30 = vpop.eup %288 }
  0xc0   :  { %v83_v31 = vmul.f32 %v289_v30, %v231_v29 }
  0xc2   :  { %v87_v36 = vmul.f32 %v85_v32, %v83_v31 }
  0xc3   :  { %v291_v33 = vpop.eup %290 }
  0xc4   :  { %v84_v35 = vmul.f32 %v291_v33, %v231_v29  ;;  %v96_v39 = vadd.f32 %v232_v37, %v87_v36 }
  0xc6   :  { %v88_v38 = vmul.f32 %v86_v34, %v84_v35 }
  0xc8   :  { %v97_v40 = vadd.f32 %v232_v37, %v88_v38 }
  0xca   :  { %v98_v41 = vpack.c.bf16 %v97_v40, %v96_v39 }
  0xcc   :  { %268 = vmatmul.mubr.bf16.vlgmr.msra.gmra.mxu0 %v98_v41 }
 0x18c   :  { %v204_v43 = vpop.f32.mrf.mxu0 }
 0x18d   :  { %v205_v44 = vadd.f32 %v233_v42, %v204_v43 }
 0x18e   :  { %v269_v45 = vpop.f32.mrf.mxu0 }
 0x18f   :  { %211 = vst [vmem:[#allocation7] sm:$0xff] %v205_v44 }
 0x190   :  { %v207_v46 = vpop.f32.mrf.mxu0 }
 0x191   :  { %v208_v47 = vadd.f32 %v233_v42, %v207_v46 }
 0x192   :  { %v270_v48 = vpop.f32.mrf.mxu0 }
 0x193   :  { %212 = vst [vmem:[#allocation7 + $0x8] sm:$0xff] %v208_v47 }
 0x194   :  { %343 = shalt.err (!%p340_p0)
}
 0x195   :  { %224 = dma.vmem_to_hbm [thread:$0]  %s219_s11, 256, %s426_s5, [#allocation4], %s359_s21, %s359_s21, %s360_s22  }
 0x196   :  { %356 = dma.done.wait [#allocation4], 256  }
 0x197   :  { %357 = vsyncadd [#allocation4], 4294967040 }
 0x198   :  { %228 = vsyncpa [#allocation3], 1 }
 0x199   :  { %229 = vsyncpa [#allocation6], 1 }
 0x19a   :  { %230 = vsyncpa [#allocation4], 1 }

</bundles_post_ra>
